<compile_context>
chip_gen: v7x
topology: tpu7x:2x2x1
jax: 0.10.0
libtpu: 0.0.40
codegen_flags: <defaults>
</compile_context>

<pallas_src>
import math

import numpy as np
import jax
import jax.numpy as jnp
from jax.experimental import pallas as pl
from jax.experimental.pallas import tpu as pltpu


def _make_kernel(Cin, Cout, H, W, KH, KW, neg_slope):
    HW = H * W
    ph, pw = (KH - 1) // 2, (KW - 1) // 2

    def kernel(x_ref, w_ref, b_ref, m_ref, o_ref):
        # x_ref: (1, Cin, H*W)        one image, CHW flattened (lane axis = H*W, dense)
        # w_ref: (Cout, KH*KW*Cin)    equalized scale already folded in
        # b_ref: (Cout, 1)
        # m_ref: (KH*KW, H*W)         per-tap boundary masks (1 inside image, 0 in zero-pad)
        # o_ref: (1, Cout, H*W)       lane-dense output
        x = x_ref[0]                                    # (Cin, HW), native dtype

        taps = []
        for kh in range(KH):
            for kw in range(KW):
                t = kh * KW + kw
                s = (kh - ph) * W + (kw - pw)           # flat input offset of this tap
                if s == 0:
                    # center tap: no shift, never touches the padding
                    taps.append(x)
                else:
                    # lane-axis rotate (XLU) instead of an unaligned 2-D slice copy;
                    # wrapped / zero-padded contributions are killed by the mask.
                    shifted = pltpu.roll(x, shift=(-s) % HW, axis=1)
                    taps.append(shifted * m_ref[pl.ds(t, 1), :])

        # im2col: one (Cout, K) @ (K, H*W) matmul instead of 9 K=Cin matmuls.
        patches = jnp.concatenate(taps, axis=0)         # (KH*KW*Cin, HW)
        y = jax.lax.dot_general(
            w_ref[...], patches,
            dimension_numbers=(((1,), (0,)), ((), ())),
            preferred_element_type=jnp.float32)         # (Cout, HW) f32 accumulator

        y = y + b_ref[...].astype(jnp.float32)          # bias (broadcast over H*W)
        y = jnp.maximum(y, neg_slope * y)               # LeakyReLU(0.2)
        o_ref[0] = y.astype(o_ref.dtype)                # dense, unmasked stores

    return kernel


def constrained_conv2d(x_nchw, weight, bias, *, scale, neg_slope=0.2):
    """ConstrainedLayer(Conv2d(Cin, Cout, 3, padding=1), activation='lrelu').

    x_nchw: (N, Cin, H, W)    weight: (Cout, Cin, KH, KW)    bias: (Cout,)
    Returns (N, Cout, H, W).
    """
    N, Cin, H, W = x_nchw.shape
    Cout, Cin_w, KH, KW = weight.shape
    assert Cin_w == Cin
    # Same-padding, odd kernel, stride 1 (matches the module's Conv2d(.., 3, padding=1)).
    assert KH % 2 == 1 and KW % 2 == 1
    HW = H * W
    K = KH * KW * Cin
    ph, pw = (KH - 1) // 2, (KW - 1) // 2

    # --- free views / tiny one-time prep (no HBM sweeps over the activations) ---
    x_flat = x_nchw.reshape(N, Cin, HW)                                  # free reshape
    # Fold equalized-LR scale into the weights; reorder to rows = [kh, kw, ci].
    w_mat = (jnp.transpose(weight, (0, 2, 3, 1)).reshape(Cout, K) * scale).astype(weight.dtype)
    b_col = bias.reshape(Cout, 1)

    # Static 0/1 boundary masks, one per tap (KH*KW, H*W): replaces explicit zero padding.
    masks_np = np.zeros((KH * KW, HW), dtype=np.float32)
    hh = np.arange(H)[:, None]
    ww = np.arange(W)[None, :]
    for kh in range(KH):
        for kw in range(KW):
            src_h = hh + (kh - ph)
            src_w = ww + (kw - pw)
            valid = (src_h >= 0) & (src_h < H) & (src_w >= 0) & (src_w < W)
            masks_np[kh * KW + kw] = valid.reshape(-1)
    masks = jnp.asarray(masks_np, dtype=x_nchw.dtype)

    kernel = _make_kernel(Cin, Cout, H, W, KH, KW, float(neg_slope))

    out_flat = pl.pallas_call(
        kernel,
        out_shape=jax.ShapeDtypeStruct((N, Cout, HW), x_nchw.dtype),
        grid_spec=pltpu.PrefetchScalarGridSpec(
            num_scalar_prefetch=0,
            grid=(N,),
            in_specs=[
                pl.BlockSpec((1, Cin, HW), lambda n: (n, 0, 0)),   # image n
                pl.BlockSpec((Cout, K), lambda n: (0, 0)),         # weights (resident)
                pl.BlockSpec((Cout, 1), lambda n: (0, 0)),         # bias (resident)
                pl.BlockSpec((KH * KW, HW), lambda n: (0, 0)),     # masks (resident)
            ],
            out_specs=pl.BlockSpec((1, Cout, HW), lambda n: (n, 0, 0)),
        ),
        compiler_params=pltpu.CompilerParams(
            dimension_semantics=("parallel",),                     # batch axis: megacore/2-TC
        ),
    )(x_flat, w_mat, b_col, masks)

    return out_flat.reshape(N, Cout, H, W)                         # free reshape back to NCHW


def reference_constrained_conv2d(x_nchw, weight, bias, *, scale, neg_slope=0.2):
    """Pure-JAX reference (mirrors torch Conv2d on NCHW)."""
    y = jax.lax.conv_general_dilated(
        (x_nchw * scale).astype(jnp.float32),
        weight.astype(jnp.float32),
        window_strides=(1, 1),
        padding="SAME",
        dimension_numbers=("NCHW", "OIHW", "NCHW"),
    )
    y = y + bias.reshape(1, -1, 1, 1)
    return jnp.where(y > 0, y, neg_slope * y)


if __name__ == "__main__":
    # Small shapes consistent with the module's forward (NCHW conv input).
    N, Cin, H, W = 2, 4, 16, 16
    Cout, KH, KW = 8, 3, 3

    key = jax.random.PRNGKey(0)
    kx, kw = jax.random.split(key)

    x = jax.random.normal(kx, (N, Cin, H, W), dtype=jnp.float32)

    # ConstrainedLayer.__init__: weight ~ N(0, 1), bias = 0, equalized (He) scale.
    weight = jax.random.normal(kw, (Cout, Cin, KH, KW), dtype=jnp.float32)
    bias = jnp.zeros((Cout,), dtype=jnp.float32)

    activation_slope = 0.2                       # 'lrelu'
    fanin = Cin * KH * KW                        # np.prod(weight.size()[1:])
    scale = math.sqrt(2.0 / ((1 + activation_slope ** 2) * fanin))

    out = constrained_conv2d(x, weight, bias, scale=scale, neg_slope=activation_slope)
    out = jax.block_until_ready(out)

    ref = reference_constrained_conv2d(x, weight, bias, scale=scale,
                                       neg_slope=activation_slope)
    ref = jax.block_until_ready(ref)

    assert out.shape == (N, Cout, H, W), out.shape
    err = float(jnp.max(jnp.abs(out - ref)))
    assert err < 1e-4, f"max abs error {err}"

    print("KERNEL_OK")
</pallas_src>

<mosaic_0001>
module attributes {stable_mosaic.version = 11 : i64} {
  func.func @kernel(%arg0: i32, %arg1: memref<1x4x256xf32, #tpu.memory_space<vmem>>, %arg2: memref<8x36xf32, #tpu.memory_space<vmem>>, %arg3: memref<8x1xf32, #tpu.memory_space<vmem>>, %arg4: memref<9x256xf32, #tpu.memory_space<vmem>>, %arg5: memref<1x8x256xf32, #tpu.memory_space<vmem>>) attributes {dimension_semantics = [#tpu.dimension_semantics<parallel>], iteration_bounds = array<i64: 2>, scalar_prefetch = 0 : i64, scratch_operands = 0 : i64, tpu.core_type = #tpu.core_type<tc>, window_params = [{transform_indices = @transform_0, window_bounds = array<i64: 1, 4, 256>}, {pipeline_mode = #tpu.pipeline_mode<synchronous>, transform_indices = @transform_1, window_bounds = array<i64: 8, 36>}, {pipeline_mode = #tpu.pipeline_mode<synchronous>, transform_indices = @transform_2, window_bounds = array<i64: 8, 1>}, {pipeline_mode = #tpu.pipeline_mode<synchronous>, transform_indices = @transform_3, window_bounds = array<i64: 9, 256>}, {transform_indices = @transform_4, window_bounds = array<i64: 1, 8, 256>}]} {
    %c0 = arith.constant 0 : index
    %c0_0 = arith.constant 0 : index
    %c0_1 = arith.constant 0 : index
    %0 = vector.load %arg1[%c0, %c0_0, %c0_1] : memref<1x4x256xf32, #tpu.memory_space<vmem>>, vector<1x4x256xf32>
    %1 = vector.shape_cast %0 : vector<1x4x256xf32> to vector<4x256xf32>
    %c17_i32 = arith.constant 17 : i32
    %2 = tpu.dynamic_rotate %1 by %c17_i32 dim 1 : vector<4x256xf32>, i32 -> vector<4x256xf32>
    %c0_2 = arith.constant 0 : index
    %c0_3 = arith.constant 0 : index
    %3 = vector.load %arg4[%c0_2, %c0_3] : memref<9x256xf32, #tpu.memory_space<vmem>>, vector<1x256xf32>
    %4 = vector.broadcast %3 : vector<1x256xf32> to vector<4x256xf32>
    %5 = arith.mulf %2, %4 : vector<4x256xf32>
    %c16_i32 = arith.constant 16 : i32
    %6 = tpu.dynamic_rotate %1 by %c16_i32 dim 1 : vector<4x256xf32>, i32 -> vector<4x256xf32>
    %c1 = arith.constant 1 : index
    %c0_4 = arith.constant 0 : index
    %7 = vector.load %arg4[%c1, %c0_4] : memref<9x256xf32, #tpu.memory_space<vmem>>, vector<1x256xf32>
    %8 = vector.broadcast %7 : vector<1x256xf32> to vector<4x256xf32>
    %9 = arith.mulf %6, %8 : vector<4x256xf32>
    %c15_i32 = arith.constant 15 : i32
    %10 = tpu.dynamic_rotate %1 by %c15_i32 dim 1 : vector<4x256xf32>, i32 -> vector<4x256xf32>
    %c2 = arith.constant 2 : index
    %c0_5 = arith.constant 0 : index
    %11 = vector.load %arg4[%c2, %c0_5] : memref<9x256xf32, #tpu.memory_space<vmem>>, vector<1x256xf32>
    %12 = vector.broadcast %11 : vector<1x256xf32> to vector<4x256xf32>
    %13 = arith.mulf %10, %12 : vector<4x256xf32>
    %c1_i32 = arith.constant 1 : i32
    %14 = tpu.dynamic_rotate %1 by %c1_i32 dim 1 : vector<4x256xf32>, i32 -> vector<4x256xf32>
    %c3 = arith.constant 3 : index
    %c0_6 = arith.constant 0 : index
    %15 = vector.load %arg4[%c3, %c0_6] : memref<9x256xf32, #tpu.memory_space<vmem>>, vector<1x256xf32>
    %16 = vector.broadcast %15 : vector<1x256xf32> to vector<4x256xf32>
    %17 = arith.mulf %14, %16 : vector<4x256xf32>
    %c255_i32 = arith.constant 255 : i32
    %18 = tpu.dynamic_rotate %1 by %c255_i32 dim 1 : vector<4x256xf32>, i32 -> vector<4x256xf32>
    %c5 = arith.constant 5 : index
    %c0_7 = arith.constant 0 : index
    %19 = vector.load %arg4[%c5, %c0_7] : memref<9x256xf32, #tpu.memory_space<vmem>>, vector<1x256xf32>
    %20 = vector.broadcast %19 : vector<1x256xf32> to vector<4x256xf32>
    %21 = arith.mulf %18, %20 : vector<4x256xf32>
    %c241_i32 = arith.constant 241 : i32
    %22 = tpu.dynamic_rotate %1 by %c241_i32 dim 1 : vector<4x256xf32>, i32 -> vector<4x256xf32>
    %c6 = arith.constant 6 : index
    %c0_8 = arith.constant 0 : index
    %23 = vector.load %arg4[%c6, %c0_8] : memref<9x256xf32, #tpu.memory_space<vmem>>, vector<1x256xf32>
    %24 = vector.broadcast %23 : vector<1x256xf32> to vector<4x256xf32>
    %25 = arith.mulf %22, %24 : vector<4x256xf32>
    %c240_i32 = arith.constant 240 : i32
    %26 = tpu.dynamic_rotate %1 by %c240_i32 dim 1 : vector<4x256xf32>, i32 -> vector<4x256xf32>
    %c7 = arith.constant 7 : index
    %c0_9 = arith.constant 0 : index
    %27 = vector.load %arg4[%c7, %c0_9] : memref<9x256xf32, #tpu.memory_space<vmem>>, vector<1x256xf32>
    %28 = vector.broadcast %27 : vector<1x256xf32> to vector<4x256xf32>
    %29 = arith.mulf %26, %28 : vector<4x256xf32>
    %c239_i32 = arith.constant 239 : i32
    %30 = tpu.dynamic_rotate %1 by %c239_i32 dim 1 : vector<4x256xf32>, i32 -> vector<4x256xf32>
    %c8 = arith.constant 8 : index
    %c0_10 = arith.constant 0 : index
    %31 = vector.load %arg4[%c8, %c0_10] : memref<9x256xf32, #tpu.memory_space<vmem>>, vector<1x256xf32>
    %32 = vector.broadcast %31 : vector<1x256xf32> to vector<4x256xf32>
    %33 = arith.mulf %30, %32 : vector<4x256xf32>
    %34 = tpu.concatenate %5, %9, %13, %17, %1, %21, %25, %29, %33 in 0 : vector<4x256xf32>, vector<4x256xf32>, vector<4x256xf32>, vector<4x256xf32>, vector<4x256xf32>, vector<4x256xf32>, vector<4x256xf32>, vector<4x256xf32>, vector<4x256xf32> -> vector<36x256xf32>
    %c0_11 = arith.constant 0 : index
    %c0_12 = arith.constant 0 : index
    %35 = vector.load %arg2[%c0_11, %c0_12] : memref<8x36xf32, #tpu.memory_space<vmem>>, vector<8x36xf32>
    %cst = arith.constant dense<0.000000e+00> : vector<8x256xf32>
    %36 = tpu.matmul %35, %34, %cst {dimension_numbers = #tpu.dot_dimension_numbers<[1], [0], [0], [1], [0, 0, 1, 1], [], []>} : vector<8x36xf32>, vector<36x256xf32>, vector<8x256xf32> -> vector<8x256xf32>
    %c0_13 = arith.constant 0 : index
    %c0_14 = arith.constant 0 : index
    %37 = vector.load %arg3[%c0_13, %c0_14] : memref<8x1xf32, #tpu.memory_space<vmem>>, vector<8x1xf32>
    %38 = vector.broadcast %37 : vector<8x1xf32> to vector<8x256xf32>
    %39 = arith.addf %36, %38 : vector<8x256xf32>
    %cst_15 = arith.constant 2.000000e-01 : f32
    %40 = vector.broadcast %cst_15 : f32 to vector<8x256xf32>
    %41 = arith.mulf %40, %39 : vector<8x256xf32>
    %42 = arith.maximumf %39, %41 : vector<8x256xf32>
    %c0_16 = arith.constant 0 : index
    %c0_17 = arith.constant 0 : index
    %c0_18 = arith.constant 0 : index
    %43 = vector.load %arg5[%c0_16, %c0_17, %c0_18] : memref<1x8x256xf32, #tpu.memory_space<vmem>>, vector<1x8x256xf32>
    %44 = vector.shape_cast %43 : vector<1x8x256xf32> to vector<8x256xf32>
    %45 = vector.shape_cast %42 : vector<8x256xf32> to vector<1x8x256xf32>
    tpu.vector_store %arg5[%c0_16, %c0_17, %c0_18], %45 {strides = array<i32>} : memref<1x8x256xf32, #tpu.memory_space<vmem>>, vector<1x8x256xf32>,
    return
  }
  func.func @transform_0(%arg0: i32) -> (i32, i32, i32) {
    %c0_i32 = arith.constant 0 : i32
    %c0_i32_0 = arith.constant 0 : i32
    %c0_i32_1 = arith.constant 0 : i32
    return %arg0, %c0_i32, %c0_i32_0 : i32, i32, i32
  }
  func.func @transform_1(%arg0: i32) -> (i32, i32) {
    %c0_i32 = arith.constant 0 : i32
    %c0_i32_0 = arith.constant 0 : i32
    %c0_i32_1 = arith.constant 0 : i32
    return %c0_i32, %c0_i32_0 : i32, i32
  }
  func.func @transform_2(%arg0: i32) -> (i32, i32) {
    %c0_i32 = arith.constant 0 : i32
    %c0_i32_0 = arith.constant 0 : i32
    %c0_i32_1 = arith.constant 0 : i32
    return %c0_i32, %c0_i32_0 : i32, i32
  }
  func.func @transform_3(%arg0: i32) -> (i32, i32) {
    %c0_i32 = arith.constant 0 : i32
    %c0_i32_0 = arith.constant 0 : i32
    %c0_i32_1 = arith.constant 0 : i32
    return %c0_i32, %c0_i32_0 : i32, i32
  }
  func.func @transform_4(%arg0: i32) -> (i32, i32, i32) {
    %c0_i32 = arith.constant 0 : i32
    %c0_i32_0 = arith.constant 0 : i32
    %c0_i32_1 = arith.constant 0 : i32
    return %arg0, %c0_i32, %c0_i32_0 : i32, i32, i32
  }
}

</mosaic_0001>

<bundles_post_ra>
// kernel: tpu_custom_call.1
= control target key start
LH: loop header
LB: loop body
LE: loop exit
PB: predicated region body
PF: predicated region fallthrough
CT: control target
= control target key end

     0   :  { %9 = vsyncpa [#allocation3], 0  ;;  %s1177_s0 = inlined_call_operand.hbm [shape: f32[2,4,256], index: 0, kind: input, shape index: {}]   ;;  %s1178_s1 = inlined_call_operand.vmem [shape: f32[8,36], index: 1, kind: input, shape index: {}]   ;;  %s1179_s2 = inlined_call_operand.vmem [shape: f32[8,1], index: 2, kind: input, shape index: {}]   ;;  %s1180_s3 = inlined_call_operand.hbm [shape: f32[9,256], index: 3, kind: input, shape index: {}]   ;;  %s1181_s4 = inlined_call_operand.hbm [shape: f32[2,8,256], index: 4, kind: output, shape index: {}]  }
   0x1   :  { %11 = vsyncpa [#allocation3 + $0x1], 0 }
   0x2   :  { %12 = vsyncpa [#allocation6], 0 }
   0x3   :  { %13 = vsyncpa [#allocation4], 0 }
   0x4   :  { %15 = vsyncpa [#allocation4 + $0x1], 0  ;;  %s902_s15 = smov 0   ;;  %s904_s16 = smov 0  }
   0x5   :  { %s906_s17 = smov 0   ;;  %s908_s18 = smov 0  }
   0x6 LB: > { %s923_s19 = sadd.s32 4294967295, %s860_s18   ;;  %s632_s20 = sadd.s32 4294967294, %s860_s18   ;;  %s860_s18 = sphi %s908_s18, %s1201_s18   ;;  %s856_s17 = sphi %s906_s17, %s1200_s17   ;;  %s852_s16 = sphi %s904_s16, %s1199_s16   ;;  %s848_s15 = sphi %s902_s15, %s1198_s15  }
   0x7   : > { %p41_p0 = scmp.ne.s32.totalorder %s852_s16, %s848_s15  ;;  %p1182_p1 = scmp.eq.s32.totalorder %s923_s19, 0 }
   0x8   : > { %p134_p3 = scmp.eq.s32.totalorder %s632_s20, 1  ;;  %p633_p5 = scmp.ge.s32.totalorder %s860_s18, 1 }
   0x9   : > { %p932_p4 = por %p1182_p1, %p41_p0  ;;  %p141_p7 = scmp.lt.s32.totalorder %s860_s18, 3 }
   0xa   : > { %p937_p6 = por %p134_p3, %p41_p0  ;;  %s862_s24 = smov [#allocation5]  }
   0xb   : > { %s1185_s21 = scalar_select %p932_p4, 1, 0 }
   0xc   : > { %s1186_s22 = scalar_select %p937_p6, 1, 0 }
   0xd   : > { %p942_p8 = pnand %p633_p5, %p141_p7  ;;  %s159_s25 = sshll.u32 %s862_s24, 4  ;;  %s946_s25 = int_to_ptr.vmem [resolvable:$true] %s159_s25 }
   0xe   : > { %s958_s27 = sadd.s32 1, %s860_s18   ;;  %s28_s28 = sadd.s32 1, %s856_s17 }
   0xf   : > { %s1187_s23 = scalar_select %p942_p8, 1, 0 }
  0x10   : > { %p669_p9 = pneg %p942_p8  ;;  %s25_s29 = ssub.s32 %s860_s18, %s958_s27 }
  0x11   : > { %s732_s6 = scalar_lea.hbm %s1180_s3, 512 }
  0x12   : > { %p953_p11 = pnand %p669_p9, %p1182_p1  ;;  %p733_p12 = scmp.ne.s32.totalorder %s1180_s3, %s732_s6 }
  0x13   : > { %p739_p5 = scmp.lt.u32.totalorder %s732_s6, %s1180_s3 }
  0x14   : > { %p734_p13 = pneg %p953_p11 }
  0x16   : > { %p735_p0 = pnand %p734_p13, %p733_p12 }
  0x18   : > { %p736_p3 = pneg %p735_p0 }
  0x1a   : > { %p741_p7 = pnand %p739_p5, %p736_p3 }
  0x1c   : > { %744 = shalt.err (!%p741_p7)
}
  0x1d   : > { %s745_s11 = scalar_lea.vmem %s946_s25, 512  ;;  %p753_p2 = scmp.lt.s32.totalorder %s946_s25, %s946_s25 }
  0x1e   : > { %p746_p9 = scmp.ne.s32.totalorder %s946_s25, %s745_s11  ;;  %p754_p6 = scmp.lt.s32.totalorder %s745_s11, %s745_s11 }
  0x20   : > { %p748_p10 = pnand %p746_p9, %p734_p13  ;;  %p755_p4 = por %p754_p6, %p753_p2 }
  0x22   : > { %p749_p1 = pneg %p748_p10 }
  0x24   : > { %p756_p8 = pnand %p755_p4, %p749_p1 }
  0x26   : > { %759 = shalt.err (!%p756_p8)
}
  0x27   : > { %s863_s12 = smov 256   ;;  %s864_s13 = smov 16  }
  0x28   : > { %672 = dma.hbm_to_vmem [thread:$0]  (!%p953_p11), %s1180_s3, 512, %s946_s25, [#allocation6], %s863_s12, %s863_s12, %s864_s13  }
  0x29   : > { %p26_p2 = scmp.eq.s32.totalorder %s25_s29, 0  ;;  %p35_p1 = scmp.ne.s32.totalorder %s856_s17, %s852_s16 }
  0x2a   : > { %p36_p4 = scmp.eq.s32.totalorder %s860_s18, 0  ;;  %p682_p6 = scmp.lt.s32.totalorder %s860_s18, 2 }
  0x2b   : > { %s989_s24 = scalar_select %p26_p2, %s856_s17, %s28_s28  }
  0x2c   : > { %p37_p8 = por %p36_p4, %p35_p1  ;;  %p1189_p10 = scmp.eq.s32.totalorder %s923_s19, 1 }
  0x2d   : > { %s173_s5 = sand.u32 1, %s856_s17   ;;  %s651_s6 = sshll.u32 %s860_s18, 7 }
  0x2e   : > { %p993_p12 = por %p1189_p10, %p35_p1  ;;  %s636_s7 = sshll.u32 %s173_s5, 3 }
  0x2f   : > { %s1002_s9 = scalar_lea.hbm %s1177_s0, %s651_s6  ;;  %s177_s25 = scalar_lea.vmem [#allocation2], %s636_s7 }
  0x30   : > { %s185_s28 = sshll.u32 %s177_s25, 4  ;;  %p1004_p11 = pnand %p682_p6, %p37_p8  ;;  %s1008_s28 = int_to_ptr.vmem [resolvable:$true] %s185_s28 }
  0x31   : > { %s174_s10 = scalar_lea.sflag [#allocation3], %s173_s5  ;;  %s760_s11 = scalar_lea.hbm %s1002_s9, 128 }
  0x32   : > { %p761_p13 = scmp.ne.s32.totalorder %s1002_s9, %s760_s11  ;;  %p762_p0 = pneg %p1004_p11 }
  0x33   : > { %s765_s14 = scalar_lea.hbm %s1177_s0, 256  ;;  %p766_p7 = scmp.lt.u32.totalorder %s1002_s9, %s1177_s0 }
  0x34   : > { %p763_p3 = pnand %p762_p0, %p761_p13  ;;  %p767_p9 = scmp.lt.u32.totalorder %s765_s14, %s760_s11 }
  0x35   : > { %p769_p1 = scmp.lt.u32.totalorder %s760_s11, %s1002_s9 }
  0x36   : > { %p764_p5 = pneg %p763_p3  ;;  %p768_p2 = por %p767_p9, %p766_p7 }
  0x38   : > { %p770_p4 = por %p769_p1, %p768_p2 }
  0x3a   : > { %p771_p6 = pnand %p770_p4, %p764_p5 }
  0x3c   : > { %774 = shalt.err (!%p771_p6)
}
  0x3d   : > { %s775_s5 = scalar_lea.vmem %s1008_s28, 128  ;;  %s865_s7 = smov [#allocation2]  }
  0x3e   : > { %p776_p8 = scmp.ne.s32.totalorder %s1008_s28, %s775_s5  ;;  %s780_s26 = sshll.u32 %s865_s7, 4  ;;  %s781_s26 = int_to_ptr.vmem [resolvable:$false] %s780_s26 }
  0x3f   : > { %s782_s8 = scalar_lea.vmem %s781_s26, 256  ;;  %p783_p3 = scmp.lt.s32.totalorder %s1008_s28, %s781_s26 }
  0x40   : > { %p778_p10 = pnand %p776_p8, %p762_p0  ;;  %p784_p7 = scmp.lt.s32.totalorder %s782_s8, %s775_s5 }
  0x42   : > { %p779_p13 = pneg %p778_p10  ;;  %p785_p9 = por %p784_p7, %p783_p3 }
  0x44   : > { %p786_p2 = pnand %p785_p9, %p779_p13 }
  0x46   : > { %789 = shalt.err (!%p786_p2)
}
  0x47   : > { %676 = dma.hbm_to_vmem [thread:$0]  (!%p1004_p11), %s1002_s9, 128, %s1008_s28, %s174_s10  }
  0x48   : > { %p1192_p5 = scmp.ne.s32.totalorder %s1187_s23, 0 }
  0x49   : > { %s1038_s25 = sand.u32 (!%p1192_p5), 1, %s852_s16   ;;  %p1193_p0 = scmp.ne.s32.totalorder (!%p1192_p5), %s1185_s21, 0 }
  0x4a   : > { %194 = sbr.rel (%p1192_p5) target bundleno = 470 (0x1d6), region = 36  ;;  %s640_s11 = sshll.u32 (!%p1192_p5), %s1038_s25, 3 }
  0x4b   : > { %s197_s12 = scalar_lea.sflag (!%p1192_p5), [#allocation3], %s1038_s25  ;;  %s200_s13 = scalar_lea.vmem (!%p1192_p5), [#allocation2], %s640_s11 }
  0x51   : > { %835 = dma.done.wait (%p1193_p0), %s197_s12, 128  }
  0x52   : > { %837 = vsyncadd (%p1193_p0), %s197_s12, 4294967168  ;;  %p1194_p1 = scmp.eq.s32.totalorder %s923_s19, 0 }
  0x54   : > { %839 = dma.done.wait (%p1194_p1), [#allocation6], 512   ;;  %p1195_p11 = pmov %p1194_p1 }
  0x55   : > { %v1050_v0 = vld [vmem:[%s200_s13] sm:$0xff]  ;;  %s866_s23 = smov 1   ;;  %s867_s9 = smov 16   ;;  %v872_v2 = vmov 0.0   ;;  %v874_v3 = vmov 0   ;;  %v237_v5 = vlaneseq  ;;  %vm434_vm4 = vcmask 1043456  }
  0x56   : > { %841 = vsyncadd (%p1195_p11), [#allocation6], 4294966784  ;;  %300 = vrot.lane.b32.xlu1 %v1050_v0, %s866_s23  ;;  %256 = vrot.lane.b32.xlu0 %v1050_v0, %s867_s9  ;;  %v1056_v1 = vcombine.high %v1050_v0, %v1050_v0  ;;  %s868_s21 = smov 17   ;;  %s869_s28 = smov 15   ;;  %v444_v4 = vld [vmem:[%s1179_s2] sm:$0xff]  ;;  %vm450_vm9 = vcmask 293888  }
  0x57   : > { %s870_s29 = smov 127   ;;  %s871_s10 = smov 112   ;;  %524 = vmatprep.mubr.f32.mxu0 %v872_v2  ;;  %730 = vset.pattern.permute.xlu0 %v874_v3  ;;  %v245_v6 = vshrl.u32 %v237_v5, 7  ;;  %v1075_v7 = vand.u32 127, %v237_v5 }
  0x58   : > { %s873_s14 = smov 113   ;;  %s875_s20 = smov 111   ;;  %v308_v12 = vld [vmem:[#allocation5 + $0x3] ss:$8 sm:$0x3] }
  0x59   : > { %v1077_v10 = vsub.s32 0, %v245_v6  ;;  %v1079_v11 = vsub.s32 1, %v245_v6  ;;  %vm304_vm0 = vcmp.lt.s32.totalorder %v1075_v7, 1  ;;  %v264_v13 = vld [vmem:[#allocation5 + $0x1] ss:$8 sm:$0x3] }
  0x5a   : > { %233 = vrot.lane.b32.xlu0 %v1050_v0, %s868_s21  ;;  %302 = vrot.lane.b32.xlu1 %v1056_v1, %s866_s23  ;;  %v242_v18 = vld [vmem:[#allocation5] ss:$8 sm:$0x3]  ;;  %vm260_vm1 = vcmp.lt.s32.totalorder %v1075_v7, 16  ;;  %vm239_vm2 = vcmp.lt.s32.totalorder %v1075_v7, 17  ;;  %vm282_vm3 = vcmp.lt.s32.totalorder %v1075_v7, 15 }
  0x5b   : > { %v313_v16 = vrot.slane %v308_v12, %v1077_v10  ;;  %v317_v17 = vrot.slane %v308_v12, %v1079_v11  ;;  %v269_v21 = vrot.slane %v264_v13, %v1077_v10  ;;  %v273_v22 = vrot.slane %v264_v13, %v1079_v11  ;;  %v286_v23 = vld [vmem:[#allocation5 + $0x2] ss:$8 sm:$0x3]  ;;  %v330_v42 = vld [vmem:[#allocation5 + $0x5] ss:$8 sm:$0x3] }
  0x5c   : > { %v247_v24 = vrot.slane %v242_v18, %v1077_v10  ;;  %v251_v25 = vrot.slane %v242_v18, %v1079_v11  ;;  %v291_v34 = vrot.slane %v286_v23, %v1077_v10  ;;  %v295_v35 = vrot.slane %v286_v23, %v1079_v11  ;;  %v374_v53 = vld [vmem:[#allocation5 + $0x7] ss:$8 sm:$0x3]  ;;  %v396_v18 = vld [vmem:[#allocation5 + $0x10] ss:$8 sm:$0x3] }
  0x5d   : > { %vm326_vm5 = vcmp.lt.s32.totalorder %v1075_v7, 127  ;;  %v335_v51 = vrot.slane %v330_v42, %v1077_v10  ;;  %v339_v52 = vrot.slane %v330_v42, %v1079_v11  ;;  %vm370_vm6 = vcmp.lt.s32.totalorder %v1075_v7, 112  ;;  %s642_s8 = sshll.u32 %s1038_s25, 4  ;;  %s652_s11 = sshll.u32 %s923_s19, 8 }
  0x5e   : > { %235 = vrot.lane.b32.xlu1 %v1056_v1, %s868_s21  ;;  %258 = vrot.lane.b32.xlu0 %v1056_v1, %s867_s9  ;;  %v379_v2 = vrot.slane %v374_v53, %v1077_v10  ;;  %v383_v3 = vrot.slane %v374_v53, %v1079_v11  ;;  %vm348_vm7 = vcmp.lt.s32.totalorder %v1075_v7, 113  ;;  %vm392_vm8 = vcmp.lt.s32.totalorder %v1075_v7, 111  ;;  %s228_s12 = scalar_lea.vmem [#allocation7], %s642_s8  ;;  %s1133_s21 = scalar_lea.hbm %s1181_s4, %s652_s11 }
  0x5f   : > { %s552_s13 = sshll.u32 %s228_s12, 4  ;;  %s876_s19 = smov [#allocation7]   ;;  %s1135_s13 = int_to_ptr.vmem [resolvable:$true] %s552_s13 }
  0x62   : > { %280 = vrot.lane.b32.xlu1 %v1056_v1, %s869_s28  ;;  %278 = vrot.lane.b32.xlu0 %v1050_v0, %s869_s28  ;;  %s538_s28 = scalar_lea.sflag [#allocation4], %s1038_s25 }
  0x66   : > { %324 = vrot.lane.b32.xlu1 %v1056_v1, %s870_s29  ;;  %322 = vrot.lane.b32.xlu0 %v1050_v0, %s870_s29  ;;  %s790_s29 = scalar_lea.vmem %s1135_s13, 256 }
  0x67   : > { %p791_p4 = scmp.ne.s32.totalorder %s1135_s13, %s790_s29 }
  0x69   : > { %p792_p6 = pnand %p791_p4, %p993_p12 }
  0x6a   : > { %368 = vrot.lane.b32.xlu1 %v1056_v1, %s871_s10  ;;  %366 = vrot.lane.b32.xlu0 %v1050_v0, %s871_s10  ;;  %s794_s10 = sshll.u32 %s876_s19, 4  ;;  %s795_s10 = int_to_ptr.vmem [resolvable:$false] %s794_s10 }
  0x6b   : > { %p793_p8 = pneg %p792_p6  ;;  %p797_p10 = scmp.lt.s32.totalorder %s1135_s13, %s795_s10 }
  0x6e   : > { %346 = vrot.lane.b32.xlu1 %v1056_v1, %s873_s14  ;;  %344 = vrot.lane.b32.xlu0 %v1050_v0, %s873_s14  ;;  %s796_s14 = scalar_lea.vmem %s795_s10, 512 }
  0x6f   : > { %p798_p13 = scmp.lt.s32.totalorder %s796_s14, %s790_s29 }
  0x71   : > { %p799_p3 = por %p798_p13, %p797_p10 }
  0x72   : > { %390 = vrot.lane.b32.xlu1 %v1056_v1, %s875_s20  ;;  %388 = vrot.lane.b32.xlu0 %v1050_v0, %s875_s20 }
  0x73   : > { %p800_p7 = pnand %p799_p3, %p793_p8 }
  0x76   : > { %447 = vperm.xlu0 %730, %v444_v4   ;;  %v352_v4 = vld [vmem:[#allocation5 + $0x6] ss:$8 sm:$0x3] }
  0xc8   : > { %v301_v8 = vpop.permute.xlu1 %300  ;;  %v257_v9 = vpop.permute.xlu0 %256 }
  0xcc   : > { %v234_v14 = vpop.permute.xlu0 %233  ;;  %v303_v15 = vpop.permute.xlu1 %302 }
  0xcd   : > { %v305_v19 = vsel %vm304_vm0, %v301_v8, %v303_v15  ;;  %v306_v20 = vsel %vm304_vm0, %v303_v15, %v301_v8 }
  0xce   : > { %v320_v28 = vmul.f32 %v313_v16, %v306_v20  ;;  %v321_v29 = vmul.f32 %v317_v17, %v305_v19  ;;  %v357_v16 = vrot.slane %v352_v4, %v1077_v10  ;;  %v361_v17 = vrot.slane %v352_v4, %v1079_v11 }
  0xd0   : > { %v236_v26 = vpop.permute.xlu1 %235  ;;  %v259_v27 = vpop.permute.xlu0 %258  ;;  %v418_v43 = vrot.slane %v320_v28, 4  ;;  %v419_v44 = vrot.slane %v321_v29, 4 }
  0xd1   : > { %v261_v30 = vsel %vm260_vm1, %v257_v9, %v259_v27  ;;  %v262_v31 = vsel %vm260_vm1, %v259_v27, %v257_v9  ;;  %v240_v36 = vsel %vm239_vm2, %v234_v14, %v236_v26  ;;  %v241_v37 = vsel %vm239_vm2, %v236_v26, %v234_v14 }
  0xd2   : > { %v276_v32 = vmul.f32 %v269_v21, %v262_v31  ;;  %v277_v33 = vmul.f32 %v273_v22, %v261_v30  ;;  %v254_v47 = vmul.f32 %v247_v24, %v241_v37  ;;  %v255_v48 = vmul.f32 %v251_v25, %v240_v36 }
  0xd3   : > { %v405_v25 = vrot.slane %v396_v18, %v1079_v11  ;;  %v401_v30 = vrot.slane %v396_v18, %v1077_v10 }
  0xd4   : > { %v412_v38 = vrot.slane %v276_v32, 4  ;;  %v413_v39 = vrot.slane %v277_v33, 4  ;;  %v281_v40 = vpop.permute.xlu1 %280  ;;  %v279_v41 = vpop.permute.xlu0 %278 }
  0xd5   : > { %v283_v45 = vsel %vm282_vm3, %v279_v41, %v281_v40  ;;  %v284_v46 = vsel %vm282_vm3, %v281_v40, %v279_v41 }
  0xd6   : > { %v298_v49 = vmul.f32 %v291_v34, %v284_v46  ;;  %v299_v50 = vmul.f32 %v295_v35, %v283_v45  ;;  %v436_v56 = vsel %vm434_vm4, %v255_v48, %v413_v39  ;;  %v435_v58 = vsel %vm434_vm4, %v254_v47, %v412_v38 }
  0xd8   : > { %v325_v54 = vpop.permute.xlu1 %324  ;;  %v323_v55 = vpop.permute.xlu0 %322  ;;  %v438_v57 = vsel %vm434_vm4, %v299_v50, %v419_v44  ;;  %v437_v59 = vsel %vm434_vm4, %v298_v49, %v418_v43 }
  0xd9   : > { %v327_v60 = vsel %vm326_vm5, %v323_v55, %v325_v54  ;;  %v328_v61 = vsel %vm326_vm5, %v325_v54, %v323_v55  ;;  %v653_v62 = vpack.c.bf16 %v438_v57, %v436_v56  ;;  %v655_v63 = vpack.c.bf16 %v437_v59, %v435_v58 }
  0xda   : > { %v342_v5 = vmul.f32 %v335_v51, %v327_v60  ;;  %v343_v6 = vmul.f32 %v339_v52, %v328_v61 }
  0xdb   : > { %654 = vmatprep.subr.bf16.mxu0 %v653_v62 }
  0xdc   : > { %v369_v8 = vpop.permute.xlu1 %368  ;;  %656 = vmatpush1.bf16.msra.mxu0 %v655_v63  ;;  %v367_v9 = vpop.permute.xlu0 %366  ;;  %v424_v19 = vrot.slane %v342_v5, 4  ;;  %v425_v20 = vrot.slane %v343_v6, 4 }
  0xdd   : > { %v371_v12 = vsel %vm370_vm6, %v367_v9, %v369_v8  ;;  %v372_v13 = vsel %vm370_vm6, %v369_v8, %v367_v9 }
  0xde   : > { %v386_v14 = vmul.f32 %v379_v2, %v371_v12  ;;  %v387_v15 = vmul.f32 %v383_v3, %v372_v13  ;;  %v440_v32 = vsel %vm434_vm4, %v1056_v1, %v425_v20  ;;  %v439_v35 = vsel %vm434_vm4, %v1050_v0, %v424_v19  ;;  %v443_v1 = vld [vmem:[%s1178_s1] sm:$0xff] }
  0xe0   : > { %v347_v21 = vpop.permute.xlu1 %346  ;;  %v345_v22 = vpop.permute.xlu0 %344  ;;  %v430_v26 = vrot.slane %v386_v14, 4  ;;  %v431_v27 = vrot.slane %v387_v15, 4 }
  0xe1   : > { %v349_v23 = vsel %vm348_vm7, %v345_v22, %v347_v21  ;;  %v350_v24 = vsel %vm348_vm7, %v347_v21, %v345_v22 }
  0xe2   : > { %v364_v28 = vmul.f32 %v357_v16, %v349_v23  ;;  %v365_v29 = vmul.f32 %v361_v17, %v350_v24 }
  0xe4   : > { %v391_v31 = vpop.permute.xlu1 %390  ;;  %v442_v33 = vsel %vm434_vm4, %v365_v29, %v431_v27  ;;  %v389_v34 = vpop.permute.xlu0 %388  ;;  %v441_v7 = vsel %vm434_vm4, %v364_v28, %v430_v26 }
  0xe5   : > { %v657_v11 = vpack.c.bf16 %v442_v33, %v440_v32  ;;  %v393_v36 = vsel %vm392_vm8, %v389_v34, %v391_v31  ;;  %v394_v37 = vsel %vm392_vm8, %v391_v31, %v389_v34  ;;  %v659_v38 = vpack.c.bf16 %v441_v7, %v439_v35 }
  0xe6   : > { %v409_v39 = vmul.f32 %v405_v25, %v394_v37  ;;  %v408_v10 = vmul.f32 %v401_v30, %v393_v36 }
  0xe7   : > { %658 = vmatprep.subr.bf16.mxu0 %v657_v11 }
  0xe8   : > { %660 = vmatpush1.bf16.msra.mxu0 %v659_v38 }
  0xe9   : > { %643 = vmatprep.subr.msk.mxu0 %vm434_vm4, %v409_v39 }
  0xec   : > { %644 = vmatpush1.msk.msra.mxu0 %vm434_vm4, %v408_v10 }
  0xed   : > { %645 = vmatmul.mubr.msk.f32.vlgmr.msra.gmra.mrb[0].mxu0 %vm450_vm9, %v443_v1 }
  0xf5   : > { %v448_v0 = vpop.permute.xlu0 %447 }
 0x1c0   : > { %v526_v40 = vpop.f32.mrb[0].mxu0 }
 0x1c1   : > { %v527_v41 = vadd.f32 %v526_v40, %v448_v0  ;;  %v528_v42 = vpop.f32.mrb[1].mxu0 }
 0x1c2   : > { %v529_v43 = vadd.f32 %v528_v42, %v448_v0 }
 0x1c3   : > { %v531_v44 = vmul.f32 0.2, %v527_v41 }
 0x1c4   : > { %v532_v45 = vmul.f32 0.2, %v529_v43 }
 0x1c5   : > { %v533_v46 = vmax.f32 %v527_v41, %v531_v44 }
 0x1c6   : > { %v534_v47 = vmax.f32 %v529_v43, %v532_v45 }
 0x1c7   : > { %535 = vst [vmem:[%s228_s12] sm:$0xff] %v533_v46 }
 0x1c8   : > { %536 = vst [vmem:[%s228_s12 + $0x8] sm:$0xff] %v534_v47 }
 0x1c9   : > { %803 = shalt.err (!%p800_p7)
}
 0x1ca   : > { %s804_s25 = scalar_lea.hbm %s1133_s21, 256  ;;  %s808_s5 = scalar_lea.hbm %s1181_s4, 512 }
 0x1cb   : > { %p805_p9 = scmp.ne.s32.totalorder %s1133_s21, %s804_s25  ;;  %p809_p0 = scmp.lt.u32.totalorder %s1133_s21, %s1181_s4 }
 0x1cc   : > { %p810_p1 = scmp.lt.u32.totalorder %s808_s5, %s804_s25  ;;  %p812_p4 = scmp.lt.u32.totalorder %s804_s25, %s1133_s21 }
 0x1cd   : > { %p806_p2 = pnand %p805_p9, %p993_p12 }
 0x1ce   : > { %p811_p11 = por %p810_p1, %p809_p0 }
 0x1cf   : > { %p807_p5 = pneg %p806_p2 }
 0x1d0   : > { %p813_p6 = por %p812_p4, %p811_p11 }
 0x1d2   : > { %p814_p8 = pnand %p813_p6, %p807_p5 }
 0x1d4   : > { %817 = shalt.err (!%p814_p8)
}
 0x1d5   : > { %667 = dma.vmem_to_hbm [thread:$0]  (%p993_p12), %s1135_s13, 256, %s1133_s21, %s538_s28  }
 0x1d6 PF: > { %s564_s8 = sand.u32 1, %s848_s15   ;;  %p1196_p10 = scmp.ne.s32.totalorder %s1186_s22, 0 }
 0x1d7   : > { %p1197_p13 = scmp.ge.s32.totalorder %s860_s18, 2  ;;  %s565_s11 = scalar_lea.sflag [#allocation4], %s564_s8 }
 0x1d9   : > { %p678_p3 = pnand %p1197_p13, %p1196_p10 }
 0x1db   : > { %843 = dma.done.wait (!%p678_p3), %s565_s11, 256  }
 0x1dc   : > { %845 = vsyncadd (!%p678_p3), %s565_s11, 4294967040  ;;  %p18_p7 = scmp.ge.s32.totalorder %s958_s27, 4   ;;  %s1198_s15 = smov %s852_s16 }
 0x1dd   : > { %s1199_s16 = smov %s856_s17  ;;  %s1200_s17 = smov %s989_s24 }
 0x1de   : > { %s1201_s18 = smov %s958_s27  ;;  %20 = sbr.rel (!%p18_p7) target bundleno = 6 (0x6), region = 92 }
 0x1e5   :  { %570 = vsyncpa [#allocation3], 1 }
 0x1e6   :  { %572 = vsyncpa [#allocation3 + $0x1], 1 }
 0x1e7   :  { %573 = vsyncpa [#allocation6], 1 }
 0x1e8   :  { %574 = vsyncpa [#allocation4], 1 }
 0x1e9   :  { %576 = vsyncpa [#allocation4 + $0x1], 1 }

</bundles_post_ra>
